<compile_context>
chip_gen: v7x
topology: tpu7x:2x2x1
jax: 0.10.0
libtpu: 0.0.40
codegen_flags: <defaults>
</compile_context>

<pallas_src>
import functools

import jax
import jax.numpy as jnp
from jax import lax
from jax.experimental import pallas as pl
from jax.experimental.pallas import tpu as pltpu


def _round_up(n, m):
    return ((n + m - 1) // m) * m


def _vmem_cap_bytes():
    """Physical VMEM of the current TPU generation (conservative fallback)."""
    try:
        info = pltpu.get_tpu_info()
        cap = getattr(info, "vmem_capacity_bytes", None)
        if cap:
            return int(cap)
    except Exception:
        pass
    return 64 * (1 << 20)   # v7x-sized conservative fallback


def _phsic_kernel(x_ref, y_ref, out_ref, gx_acc, gy_acc,
                  *, nkx, nky, x_sigma, y_sigma, mode, f32_inputs):
    """Grid: (max(nkx, nky),) over feature chunks of x and y (reduction axis)."""
    k = pl.program_id(0)
    nk = max(nkx, nky)

    @pl.when(k == 0)
    def _init():
        gx_acc[...] = jnp.zeros_like(gx_acc)
        gy_acc[...] = jnp.zeros_like(gy_acc)

    def _accumulate(chunk_ref, gram_acc):
        c = chunk_ref[...]                                       # (B, tk) f32/bf16
        prec = lax.Precision.HIGHEST if f32_inputs else None
        # NT-form contraction of the last dims: (B, tk) x (B, tk) -> (B, B).
        # The MXU consumes the rhs transposed natively; no (tk, B) relayout.
        gram_acc[...] += lax.dot_general(
            c, c, (((1,), (1,)), ((), ())),
            preferred_element_type=jnp.float32, precision=prec)

    if nkx == nk:
        _accumulate(x_ref, gx_acc)
    else:
        pl.when(k < nkx)(lambda: _accumulate(x_ref, gx_acc))

    if nky == nk:
        _accumulate(y_ref, gy_acc)
    else:
        pl.when(k < nky)(lambda: _accumulate(y_ref, gy_acc))

    @pl.when(k == nk - 1)
    def _finalize():
        b = gx_acc.shape[0]
        rows = lax.broadcasted_iota(jnp.int32, (b, b), 0)
        cols = lax.broadcasted_iota(jnp.int32, (b, b), 1)
        diag = rows == cols

        def gaussian(gram_ref, sigma):
            gram = gram_ref[...]
            # Row norms from the gram diagonal (exact: diag(d2) == 0 by construction).
            dg = jnp.where(diag, gram, 0.0)
            sq_row = jnp.sum(dg, axis=1, keepdims=True)          # (B, 1) lane reduce
            sq_col = jnp.sum(dg, axis=0, keepdims=True)          # (1, B) sublane reduce
            d2 = jnp.maximum(sq_row + sq_col - 2.0 * gram, 0.0)  # clamp FP cancellation
            kmat = jnp.exp(d2 * (-1.0 / (2.0 * sigma * sigma)))
            gram_ref[...] = kmat   # reuse accumulator VMEM as the kernel matrix
            return kmat

        k_x = gaussian(gx_acc, x_sigma)                          # (B, B)
        k_y = gaussian(gy_acc, y_sigma)                          # (B, B)

        # estimate_hsic(a_matrix=K_y, b_matrix=K_x, mode)
        if mode == 'biased':
            a_vec = jnp.mean(k_y, axis=0, keepdims=True)         # (1, B)
            b_vec = jnp.mean(k_x, axis=0, keepdims=True)         # (1, B)
            val = (jnp.mean(k_y * k_x, keepdims=True)
                   - 2.0 * jnp.mean(a_vec * b_vec, keepdims=True)
                   + jnp.mean(a_vec, keepdims=True) * jnp.mean(b_vec, keepdims=True))
        elif mode == 'plausible':
            val = jnp.mean((k_y - jnp.mean(k_y, keepdims=True)) * k_x, keepdims=True)
        else:
            raise NotImplementedError(
                'mode must be either biased or plausible, but %s was given' % mode)

        out_ref[...] = val                                       # (1, 1)


def phsic_forward(x, y, x_sigma=1.0, y_sigma=1.0, mode='biased',
                  feature_tile=2048, use_bf16=False):
    """JAX wrapper: flatten/zero-pad inputs (glue only) and run the fused kernel."""
    if mode not in ('biased', 'plausible'):
        raise NotImplementedError(
            'mode must be either biased or plausible, but %s was given' % mode)

    in_dtype = jnp.bfloat16 if use_bf16 else jnp.float32
    x2 = x.reshape(x.shape[0], -1).astype(in_dtype)              # (B, Dx)
    y2 = y.reshape(y.shape[0], -1).astype(in_dtype)              # (B, Dy)
    B = x2.shape[0]
    assert y2.shape[0] == B, "x and y must share the batch dimension"
    dx, dy = x2.shape[1], y2.shape[1]

    # Independent, lane-aligned feature tiles for x and y (128-multiples).
    ft = _round_up(max(int(feature_tile), 128), 128)
    tk_x = min(ft, _round_up(dx, 128))
    tk_y = min(ft, _round_up(dy, 128))

    nkx = pl.cdiv(dx, tk_x)
    nky = pl.cdiv(dy, tk_y)
    nk = max(nkx, nky)

    # Zero-pad feature dims to whole tiles. Zero columns change neither squared
    # norms nor dot products, so the Gaussian grams are exact.
    x2 = jnp.pad(x2, ((0, 0), (0, nkx * tk_x - dx)))
    y2 = jnp.pad(y2, ((0, 0), (0, nky * tk_y - dy)))

    kern = functools.partial(
        _phsic_kernel, nkx=nkx, nky=nky,
        x_sigma=float(x_sigma), y_sigma=float(y_sigma),
        mode=mode, f32_inputs=not use_bf16)

    # Generation-aware VMEM budget: double-buffered input chunks, two (B,B) f32
    # gram accumulators, plus finalize temporaries, with 2x headroom; capped at
    # ~75% of physical VMEM (leaves room for compiler-internal scratch on v7x).
    itemsize = 2 if use_bf16 else 4
    in_bytes = 2 * B * (tk_x + tk_y) * itemsize   # 2 pipeline buffers per input
    acc_bytes = 2 * B * B * 4                     # gram accumulators (reused as K)
    fin_bytes = 4 * B * B * 4                     # d2 / masked diag / products
    need = in_bytes + acc_bytes + fin_bytes
    vmem_limit = int(min(max(16 * (1 << 20), 2 * need),
                         int(0.75 * _vmem_cap_bytes())))

    cost = pl.CostEstimate(
        flops=2 * B * B * (nkx * tk_x + nky * tk_y),
        transcendentals=2 * B * B,
        bytes_accessed=itemsize * B * (nkx * tk_x + nky * tk_y) + 4)

    # When one input has fewer chunks than the grid, clamp its block index to its
    # last valid chunk (the redundant compute is skipped via pl.when).
    x_index = (lambda k: (0, k)) if nkx == nk else (
        lambda k: (0, jnp.minimum(k, nkx - 1)))
    y_index = (lambda k: (0, k)) if nky == nk else (
        lambda k: (0, jnp.minimum(k, nky - 1)))

    out = pl.pallas_call(
        kern,
        out_shape=jax.ShapeDtypeStruct((1, 1), jnp.float32),
        grid_spec=pltpu.PrefetchScalarGridSpec(
            num_scalar_prefetch=0,
            grid=(nk,),
            in_specs=[pl.BlockSpec((B, tk_x), x_index),
                      pl.BlockSpec((B, tk_y), y_index)],
            out_specs=pl.BlockSpec((1, 1), lambda k: (0, 0)),
            scratch_shapes=[pltpu.VMEM((B, B), jnp.float32),    # x gram accumulator
                            pltpu.VMEM((B, B), jnp.float32)]),  # y gram accumulator
        compiler_params=pltpu.CompilerParams(
            dimension_semantics=("arbitrary",),
            vmem_limit_bytes=vmem_limit),
        cost_estimate=cost,
    )(x2, y2)
    return out[0, 0]


def _reference_phsic(x, y, x_sigma, y_sigma, mode):
    """Pure-JAX reference mirroring the PyTorch code (for correctness check)."""
    def gram(v, sigma):
        v = v.reshape(v.shape[0], -1).astype(jnp.float32)
        d2 = jnp.sum((v[:, None, :] - v[None, :, :]) ** 2, axis=-1)
        return jnp.exp(-d2 / (2.0 * sigma * sigma))

    k_x = gram(x, x_sigma)
    k_y = gram(y, y_sigma)
    a, b = k_y, k_x
    if mode == 'biased':
        a_vec = a.mean(axis=0)
        b_vec = b.mean(axis=0)
        return (a * b).mean() - 2 * (a_vec * b_vec).mean() + a_vec.mean() * b_vec.mean()
    return ((a - a.mean()) * b).mean()


if __name__ == "__main__":
    key = jax.random.PRNGKey(0)
    kx_key, ky_key = jax.random.split(key)

    # x: conv activations, NCHW (batch=8, channels=4, spatial=16x16) -> Dx=1024
    # y: label features, (batch=8, 16)                                -> Dy=16
    x = jax.random.normal(kx_key, (8, 4, 16, 16), dtype=jnp.float32)
    y = jax.random.normal(ky_key, (8, 16), dtype=jnp.float32)

    # Sigmas on the scale of the pairwise distances so the grams are non-degenerate.
    x_sigma, y_sigma = 16.0, 4.0

    out_b = jax.block_until_ready(
        phsic_forward(x, y, x_sigma=x_sigma, y_sigma=y_sigma, mode='biased'))
    ref_b = _reference_phsic(x, y, x_sigma, y_sigma, 'biased')
    assert jnp.allclose(out_b, ref_b, atol=1e-4, rtol=1e-3), (out_b, ref_b)

    out_p = jax.block_until_ready(
        phsic_forward(x, y, x_sigma=x_sigma, y_sigma=y_sigma, mode='plausible'))
    ref_p = _reference_phsic(x, y, x_sigma, y_sigma, 'plausible')
    assert jnp.allclose(out_p, ref_p, atol=1e-4, rtol=1e-3), (out_p, ref_p)

    print("KERNEL_OK")
</pallas_src>

<mosaic_0001>
module attributes {stable_mosaic.version = 11 : i64} {
  func.func @_phsic_kernel(%arg0: i32, %arg1: memref<8x1024xf32, #tpu.memory_space<vmem>>, %arg2: memref<8x128xf32, #tpu.memory_space<vmem>>, %arg3: memref<1x1xf32, #tpu.memory_space<vmem>>, %arg4: memref<8x8xf32, #tpu.memory_space<vmem>>, %arg5: memref<8x8xf32, #tpu.memory_space<vmem>>) attributes {dimension_semantics = [#tpu.dimension_semantics<arbitrary>], iteration_bounds = array<i64: 1>, scalar_prefetch = 0 : i64, scratch_operands = 2 : i64, tpu.core_type = #tpu.core_type<tc>, window_params = [{transform_indices = @transform_0, window_bounds = array<i64: 8, 1024>}, {transform_indices = @transform_1, window_bounds = array<i64: 8, 128>}, {pipeline_mode = #tpu.pipeline_mode<synchronous>, transform_indices = @transform_2, window_bounds = array<i64: 1, 1>}]} {
    %c0_i32 = arith.constant 0 : i32
    %0 = arith.cmpi eq, %arg0, %c0_i32 : i32
    %1 = arith.extui %0 : i1 to i32
    %c0_i32_0 = arith.constant 0 : i32
    %2 = arith.cmpi ne, %1, %c0_i32_0 : i32
    scf.if %2 {
      %cst_15 = arith.constant 0.000000e+00 : f32
      %16 = vector.broadcast %cst_15 : f32 to vector<8x8xf32>
      %c0_16 = arith.constant 0 : index
      %c0_17 = arith.constant 0 : index
      %17 = vector.load %arg4[%c0_16, %c0_17] : memref<8x8xf32, #tpu.memory_space<vmem>>, vector<8x8xf32>
      tpu.vector_store %arg4[%c0_16, %c0_17], %16 {strides = array<i32>} : memref<8x8xf32, #tpu.memory_space<vmem>>, vector<8x8xf32>,
      %cst_18 = arith.constant 0.000000e+00 : f32
      %18 = vector.broadcast %cst_18 : f32 to vector<8x8xf32>
      %c0_19 = arith.constant 0 : index
      %c0_20 = arith.constant 0 : index
      %19 = vector.load %arg5[%c0_19, %c0_20] : memref<8x8xf32, #tpu.memory_space<vmem>>, vector<8x8xf32>
      tpu.vector_store %arg5[%c0_19, %c0_20], %18 {strides = array<i32>} : memref<8x8xf32, #tpu.memory_space<vmem>>, vector<8x8xf32>,
    } else {
    }
    %c0 = arith.constant 0 : index
    %c0_1 = arith.constant 0 : index
    %3 = vector.load %arg1[%c0, %c0_1] : memref<8x1024xf32, #tpu.memory_space<vmem>>, vector<8x1024xf32>
    %c0_2 = arith.constant 0 : index
    %c0_3 = arith.constant 0 : index
    %4 = vector.load %arg4[%c0_2, %c0_3] : memref<8x8xf32, #tpu.memory_space<vmem>>, vector<8x8xf32>
    %cst = arith.constant dense<0.000000e+00> : vector<8x8xf32>
    %5 = tpu.matmul %3, %3, %cst {dimension_numbers = #tpu.dot_dimension_numbers<[1], [1], [0], [0], [0, 0, 1, 0], [], []>, precision = #tpu.contract_precision<fp32>} : vector<8x1024xf32>, vector<8x1024xf32>, vector<8x8xf32> -> vector<8x8xf32>
    %6 = arith.addf %4, %5 : vector<8x8xf32>
    %c0_4 = arith.constant 0 : index
    %c0_5 = arith.constant 0 : index
    %7 = vector.load %arg4[%c0_4, %c0_5] : memref<8x8xf32, #tpu.memory_space<vmem>>, vector<8x8xf32>
    tpu.vector_store %arg4[%c0_4, %c0_5], %6 {strides = array<i32>} : memref<8x8xf32, #tpu.memory_space<vmem>>, vector<8x8xf32>,
    %c0_6 = arith.constant 0 : index
    %c0_7 = arith.constant 0 : index
    %8 = vector.load %arg2[%c0_6, %c0_7] : memref<8x128xf32, #tpu.memory_space<vmem>>, vector<8x128xf32>
    %c0_8 = arith.constant 0 : index
    %c0_9 = arith.constant 0 : index
    %9 = vector.load %arg5[%c0_8, %c0_9] : memref<8x8xf32, #tpu.memory_space<vmem>>, vector<8x8xf32>
    %cst_10 = arith.constant dense<0.000000e+00> : vector<8x8xf32>
    %10 = tpu.matmul %8, %8, %cst_10 {dimension_numbers = #tpu.dot_dimension_numbers<[1], [1], [0], [0], [0, 0, 1, 0], [], []>, precision = #tpu.contract_precision<fp32>} : vector<8x128xf32>, vector<8x128xf32>, vector<8x8xf32> -> vector<8x8xf32>
    %11 = arith.addf %9, %10 : vector<8x8xf32>
    %c0_11 = arith.constant 0 : index
    %c0_12 = arith.constant 0 : index
    %12 = vector.load %arg5[%c0_11, %c0_12] : memref<8x8xf32, #tpu.memory_space<vmem>>, vector<8x8xf32>
    tpu.vector_store %arg5[%c0_11, %c0_12], %11 {strides = array<i32>} : memref<8x8xf32, #tpu.memory_space<vmem>>, vector<8x8xf32>,
    %c0_i32_13 = arith.constant 0 : i32
    %13 = arith.cmpi eq, %arg0, %c0_i32_13 : i32
    %14 = arith.extui %13 : i1 to i32
    %c0_i32_14 = arith.constant 0 : i32
    %15 = arith.cmpi ne, %14, %c0_i32_14 : i32
    scf.if %15 {
      %16 = tpu.iota {dimensions = array<i32: 0>} : vector<8x8xi32>
      %17 = tpu.iota {dimensions = array<i32: 1>} : vector<8x8xi32>
      %18 = arith.cmpi eq, %16, %17 : vector<8x8xi32>
      %c0_15 = arith.constant 0 : index
      %c0_16 = arith.constant 0 : index
      %19 = vector.load %arg4[%c0_15, %c0_16] : memref<8x8xf32, #tpu.memory_space<vmem>>, vector<8x8xf32>
      %cst_17 = arith.constant 0.000000e+00 : f32
      %20 = vector.broadcast %cst_17 : f32 to vector<8x8xf32>
      %21 = arith.select %18, %19, %20 : vector<8x8xi1>, vector<8x8xf32>
      %cst_18 = arith.constant dense<0.000000e+00> : vector<8xf32>
      %22 = vector.multi_reduction <add>, %21, %cst_18 [1] : vector<8x8xf32> to vector<8xf32>
      %23 = vector.shape_cast %22 : vector<8xf32> to vector<8x1xf32>
      %cst_19 = arith.constant dense<0.000000e+00> : vector<8xf32>
      %24 = vector.multi_reduction <add>, %21, %cst_19 [0] : vector<8x8xf32> to vector<8xf32>
      %25 = vector.shape_cast %24 : vector<8xf32> to vector<1x8xf32>
      %26 = vector.broadcast %23 : vector<8x1xf32> to vector<8x8xf32>
      %27 = vector.broadcast %25 : vector<1x8xf32> to vector<8x8xf32>
      %28 = arith.addf %26, %27 : vector<8x8xf32>
      %cst_20 = arith.constant 2.000000e+00 : f32
      %29 = vector.broadcast %cst_20 : f32 to vector<8x8xf32>
      %30 = arith.mulf %29, %19 : vector<8x8xf32>
      %31 = arith.subf %28, %30 : vector<8x8xf32>
      %cst_21 = arith.constant 0.000000e+00 : f32
      %32 = vector.broadcast %cst_21 : f32 to vector<8x8xf32>
      %33 = arith.maximumf %31, %32 : vector<8x8xf32>
      %cst_22 = arith.constant -0.001953125 : f32
      %34 = vector.broadcast %cst_22 : f32 to vector<8x8xf32>
      %35 = arith.mulf %33, %34 : vector<8x8xf32>
      %36 = math.exp %35 : vector<8x8xf32>
      %c0_23 = arith.constant 0 : index
      %c0_24 = arith.constant 0 : index
      %37 = vector.load %arg4[%c0_23, %c0_24] : memref<8x8xf32, #tpu.memory_space<vmem>>, vector<8x8xf32>
      tpu.vector_store %arg4[%c0_23, %c0_24], %36 {strides = array<i32>} : memref<8x8xf32, #tpu.memory_space<vmem>>, vector<8x8xf32>,
      %c0_25 = arith.constant 0 : index
      %c0_26 = arith.constant 0 : index
      %38 = vector.load %arg5[%c0_25, %c0_26] : memref<8x8xf32, #tpu.memory_space<vmem>>, vector<8x8xf32>
      %cst_27 = arith.constant 0.000000e+00 : f32
      %39 = vector.broadcast %cst_27 : f32 to vector<8x8xf32>
      %40 = arith.select %18, %38, %39 : vector<8x8xi1>, vector<8x8xf32>
      %cst_28 = arith.constant dense<0.000000e+00> : vector<8xf32>
      %41 = vector.multi_reduction <add>, %40, %cst_28 [1] : vector<8x8xf32> to vector<8xf32>
      %42 = vector.shape_cast %41 : vector<8xf32> to vector<8x1xf32>
      %cst_29 = arith.constant dense<0.000000e+00> : vector<8xf32>
      %43 = vector.multi_reduction <add>, %40, %cst_29 [0] : vector<8x8xf32> to vector<8xf32>
      %44 = vector.shape_cast %43 : vector<8xf32> to vector<1x8xf32>
      %45 = vector.broadcast %42 : vector<8x1xf32> to vector<8x8xf32>
      %46 = vector.broadcast %44 : vector<1x8xf32> to vector<8x8xf32>
      %47 = arith.addf %45, %46 : vector<8x8xf32>
      %cst_30 = arith.constant 2.000000e+00 : f32
      %48 = vector.broadcast %cst_30 : f32 to vector<8x8xf32>
      %49 = arith.mulf %48, %38 : vector<8x8xf32>
      %50 = arith.subf %47, %49 : vector<8x8xf32>
      %cst_31 = arith.constant 0.000000e+00 : f32
      %51 = vector.broadcast %cst_31 : f32 to vector<8x8xf32>
      %52 = arith.maximumf %50, %51 : vector<8x8xf32>
      %cst_32 = arith.constant -3.125000e-02 : f32
      %53 = vector.broadcast %cst_32 : f32 to vector<8x8xf32>
      %54 = arith.mulf %52, %53 : vector<8x8xf32>
      %55 = math.exp %54 : vector<8x8xf32>
      %c0_33 = arith.constant 0 : index
      %c0_34 = arith.constant 0 : index
      %56 = vector.load %arg5[%c0_33, %c0_34] : memref<8x8xf32, #tpu.memory_space<vmem>>, vector<8x8xf32>
      tpu.vector_store %arg5[%c0_33, %c0_34], %55 {strides = array<i32>} : memref<8x8xf32, #tpu.memory_space<vmem>>, vector<8x8xf32>,
      %cst_35 = arith.constant dense<0.000000e+00> : vector<8xf32>
      %57 = vector.multi_reduction <add>, %55, %cst_35 [0] : vector<8x8xf32> to vector<8xf32>
      %58 = vector.shape_cast %57 : vector<8xf32> to vector<1x8xf32>
      %cst_36 = arith.constant 8.000000e+00 : f32
      %59 = vector.broadcast %cst_36 : f32 to vector<1x8xf32>
      %60 = arith.divf %58, %59 : vector<1x8xf32>
      %cst_37 = arith.constant dense<0.000000e+00> : vector<8xf32>
      %61 = vector.multi_reduction <add>, %36, %cst_37 [0] : vector<8x8xf32> to vector<8xf32>
      %62 = vector.shape_cast %61 : vector<8xf32> to vector<1x8xf32>
      %cst_38 = arith.constant 8.000000e+00 : f32
      %63 = vector.broadcast %cst_38 : f32 to vector<1x8xf32>
      %64 = arith.divf %62, %63 : vector<1x8xf32>
      %65 = arith.mulf %55, %36 : vector<8x8xf32>
      %66 = vector.shape_cast %65 : vector<8x8xf32> to vector<1x8x8xf32>
      %cst_39 = arith.constant dense<0.000000e+00> : vector<1xf32>
      %67 = vector.multi_reduction <add>, %66, %cst_39 [1, 2] : vector<1x8x8xf32> to vector<1xf32>
      %68 = vector.shape_cast %67 : vector<1xf32> to vector<1x1x1xf32>
      %69 = vector.extract %68[0, 0, 0] : f32 from vector<1x1x1xf32>
      %70 = vector.broadcast %69 : f32 to vector<1x1xf32>
      %cst_40 = arith.constant 6.400000e+01 : f32
      %71 = vector.broadcast %cst_40 : f32 to vector<1x1xf32>
      %72 = arith.divf %70, %71 : vector<1x1xf32>
      %73 = arith.mulf %60, %64 : vector<1x8xf32>
      %74 = vector.shape_cast %73 : vector<1x8xf32> to vector<1x1x8xf32>
      %cst_41 = arith.constant dense<0.000000e+00> : vector<1xf32>
      %75 = vector.multi_reduction <add>, %74, %cst_41 [1, 2] : vector<1x1x8xf32> to vector<1xf32>
      %76 = vector.shape_cast %75 : vector<1xf32> to vector<1x1x1xf32>
      %77 = vector.extract %76[0, 0, 0] : f32 from vector<1x1x1xf32>
      %78 = vector.broadcast %77 : f32 to vector<1x1xf32>
      %cst_42 = arith.constant 8.000000e+00 : f32
      %79 = vector.broadcast %cst_42 : f32 to vector<1x1xf32>
      %80 = arith.divf %78, %79 : vector<1x1xf32>
      %cst_43 = arith.constant 2.000000e+00 : f32
      %81 = vector.broadcast %cst_43 : f32 to vector<1x1xf32>
      %82 = arith.mulf %81, %80 : vector<1x1xf32>
      %83 = arith.subf %72, %82 : vector<1x1xf32>
      %84 = vector.shape_cast %60 : vector<1x8xf32> to vector<1x1x8xf32>
      %cst_44 = arith.constant dense<0.000000e+00> : vector<1xf32>
      %85 = vector.multi_reduction <add>, %84, %cst_44 [1, 2] : vector<1x1x8xf32> to vector<1xf32>
      %86 = vector.shape_cast %85 : vector<1xf32> to vector<1x1x1xf32>
      %87 = vector.extract %86[0, 0, 0] : f32 from vector<1x1x1xf32>
      %88 = vector.broadcast %87 : f32 to vector<1x1xf32>
      %cst_45 = arith.constant 8.000000e+00 : f32
      %89 = vector.broadcast %cst_45 : f32 to vector<1x1xf32>
      %90 = arith.divf %88, %89 : vector<1x1xf32>
      %91 = vector.shape_cast %64 : vector<1x8xf32> to vector<1x1x8xf32>
      %cst_46 = arith.constant dense<0.000000e+00> : vector<1xf32>
      %92 = vector.multi_reduction <add>, %91, %cst_46 [1, 2] : vector<1x1x8xf32> to vector<1xf32>
      %93 = vector.shape_cast %92 : vector<1xf32> to vector<1x1x1xf32>
      %94 = vector.extract %93[0, 0, 0] : f32 from vector<1x1x1xf32>
      %95 = vector.broadcast %94 : f32 to vector<1x1xf32>
      %cst_47 = arith.constant 8.000000e+00 : f32
      %96 = vector.broadcast %cst_47 : f32 to vector<1x1xf32>
      %97 = arith.divf %95, %96 : vector<1x1xf32>
      %98 = arith.mulf %90, %97 : vector<1x1xf32>
      %99 = arith.addf %83, %98 : vector<1x1xf32>
      %c0_48 = arith.constant 0 : index
      %c0_49 = arith.constant 0 : index
      %100 = vector.load %arg3[%c0_48, %c0_49] : memref<1x1xf32, #tpu.memory_space<vmem>>, vector<1x1xf32>
      tpu.vector_store %arg3[%c0_48, %c0_49], %99 {strides = array<i32>} : memref<1x1xf32, #tpu.memory_space<vmem>>, vector<1x1xf32>,
    } else {
    }
    return
  }
  func.func @transform_0(%arg0: i32) -> (i32, i32) {
    %c0_i32 = arith.constant 0 : i32
    %c0_i32_0 = arith.constant 0 : i32
    return %c0_i32, %arg0 : i32, i32
  }
  func.func @transform_1(%arg0: i32) -> (i32, i32) {
    %c0_i32 = arith.constant 0 : i32
    %c0_i32_0 = arith.constant 0 : i32
    return %c0_i32, %arg0 : i32, i32
  }
  func.func @transform_2(%arg0: i32) -> (i32, i32) {
    %c0_i32 = arith.constant 0 : i32
    %c0_i32_0 = arith.constant 0 : i32
    %c0_i32_1 = arith.constant 0 : i32
    return %c0_i32, %c0_i32_0 : i32, i32
  }
}

</mosaic_0001>

<bundles_post_ra>
// kernel: tpu_custom_call.1
= control target key start
LH: loop header
LB: loop body
LE: loop exit
PB: predicated region body
PF: predicated region fallthrough
CT: control target
= control target key end

     0   :  { %7 = vsyncpa [#allocation5], 0  ;;  %s2797_s0 = inlined_call_operand.hbm [shape: f32[8,1024], index: 0, kind: input, shape index: {}]   ;;  %s2798_s1 = inlined_call_operand.hbm [shape: f32[8,128], index: 1, kind: input, shape index: {}]   ;;  %s2799_s2 = inlined_call_operand.hbm [shape: f32[1,1], index: 2, kind: output, shape index: {}]  }
   0x1   :  { %8 = vsyncpa [#allocation8], 0 }
   0x2   :  { %9 = vsyncpa [#allocation6], 0  ;;  %s2661_s9 = smov [#allocation4]   ;;  %s2662_s11 = smov [#allocation7]  }
   0x3   :  { %s16_s10 = sshll.u32 %s2661_s9, 4  ;;  %s26_s12 = sshll.u32 %s2662_s11, 4  ;;  %s17_s10 = int_to_ptr.vmem [resolvable:$true] %s16_s10  ;;  %s27_s12 = int_to_ptr.vmem [resolvable:$true] %s26_s12 }
   0x4   :  { %s2589_s15 = scalar_lea.hbm %s2797_s0, 1024 }
   0x5   :  { %p2590_p0 = scmp.ne.s32.totalorder %s2797_s0, %s2589_s15  ;;  %p2593_p1 = scmp.lt.u32.totalorder %s2589_s15, %s2797_s0 }
   0x7   :  { %p2595_p2 = pnand %p2593_p1, %p2590_p0 }
   0x9   :  { %2598 = shalt.err (!%p2595_p2)
}
   0xa   :  { %s2599_s20 = scalar_lea.vmem %s17_s10, 1024  ;;  %p2604_p4 = scmp.lt.s32.totalorder %s17_s10, %s17_s10 }
   0xb   :  { %p2600_p3 = scmp.ne.s32.totalorder %s17_s10, %s2599_s20  ;;  %p2605_p5 = scmp.lt.s32.totalorder %s2599_s20, %s2599_s20 }
   0xd   :  { %p2606_p6 = por %p2605_p5, %p2604_p4 }
   0xf   :  { %p2607_p7 = pnand %p2606_p6, %p2600_p3 }
  0x11   :  { %2610 = shalt.err (!%p2607_p7)
}
  0x12   :  { %19 = dma.hbm_to_vmem [thread:$0]  %s2797_s0, 1024, %s17_s10, [#allocation5]  }
  0x13   :  { %s2611_s25 = scalar_lea.hbm %s2798_s1, 128 }
  0x14   :  { %p2612_p8 = scmp.ne.s32.totalorder %s2798_s1, %s2611_s25  ;;  %p2615_p9 = scmp.lt.u32.totalorder %s2611_s25, %s2798_s1 }
  0x16   :  { %p2617_p10 = pnand %p2615_p9, %p2612_p8 }
  0x18   :  { %2620 = shalt.err (!%p2617_p10)
}
  0x19   :  { %s2621_s30 = scalar_lea.vmem %s27_s12, 128  ;;  %p2626_p12 = scmp.lt.s32.totalorder %s27_s12, %s27_s12 }
  0x1a   :  { %p2622_p11 = scmp.ne.s32.totalorder %s27_s12, %s2621_s30  ;;  %p2627_p13 = scmp.lt.s32.totalorder %s2621_s30, %s2621_s30 }
  0x1c   :  { %p2628_p0 = por %p2627_p13, %p2626_p12 }
  0x1e   :  { %p2629_p1 = pnand %p2628_p0, %p2622_p11 }
  0x20   :  { %2632 = shalt.err (!%p2629_p1)
}
  0x21   :  { %29 = dma.hbm_to_vmem [thread:$0]  %s2798_s1, 128, %s27_s12, [#allocation8]  }
  0x22   :  { %2655 = dma.done.wait [#allocation5], 1024  }
  0x23   :  { %2656 = vsyncadd [#allocation5], 4294966272 }
  0x24   :  { %2657 = dma.done.wait [#allocation8], 128  }
  0x25   :  { %2658 = vsyncadd [#allocation8], 4294967168  ;;  %v44_v0 = vld [vmem:[#allocation4 + $0x8] sm:$0xff]  ;;  %v43_v1 = vld [vmem:[#allocation4] sm:$0xff]  ;;  %v2663_v53 = vmov 0.0   ;;  %vm2664_vm0 = vmmov 0  }
  0x26   :  { %v46_v2 = vld [vmem:[#allocation4 + $0x18] sm:$0xff]  ;;  %v52_v3 = vand.u32 4294901760, %v44_v0  ;;  %v54_v4 = vand.u32 4294901760, %v43_v1  ;;  %v45_v5 = vld [vmem:[#allocation4 + $0x10] sm:$0xff]  ;;  %v48_v19 = vld [vmem:[#allocation4 + $0x28] sm:$0xff]  ;;  %vm40_vm1 = vcmask 64512  }
  0x27   :  { %v2705_v6 = vand.u32 4294901760, %v46_v2  ;;  %v2707_v9 = vand.u32 4294901760, %v45_v5  ;;  %v47_v21 = vld [vmem:[#allocation4 + $0x20] sm:$0xff]  ;;  %v2711_v23 = vand.u32 4294901760, %v48_v19  ;;  %v50_v31 = vld [vmem:[#allocation4 + $0x38] sm:$0xff]  ;;  %v49_v33 = vld [vmem:[#allocation4 + $0x30] sm:$0xff] }
  0x28   :  { %53 = vmatprep.subr.mxu0 %v52_v3  ;;  %v119_v7 = vsub.f32 %v44_v0, %v52_v3  ;;  %v125_v8 = vsub.f32 %v43_v1, %v54_v4  ;;  %209 = vmatprep.mubr.f32.mxu1 %v52_v3  ;;  %v2713_v25 = vand.u32 4294901760, %v47_v21  ;;  %v2721_v35 = vand.u32 4294901760, %v50_v31  ;;  %v1943_v44 = vld [vmem:[#allocation7] sm:$0xff]  ;;  %41 = vst.msk [vmem:[#allocation2] sm:$0xff] %vm40_vm1, %v2663_v53  ;;  %s2665_s7 = smov [#allocation9]  }
  0x29   :  { %55 = vmatpush1.xpose.msra.mxu0 %v54_v4  ;;  %v591_v12 = vsub.f32 %v46_v2, %v2705_v6  ;;  %v597_v15 = vsub.f32 %v45_v5, %v2707_v9  ;;  %v1063_v27 = vsub.f32 %v48_v19, %v2711_v23  ;;  %v2725_v37 = vand.u32 4294901760, %v49_v33  ;;  %42 = vst.msk [vmem:[#allocation3] sm:$0xff] %vm40_vm1, %v2663_v53  ;;  %s2520_s8 = sshll.u32 %s2665_s7, 4  ;;  %s2521_s8 = int_to_ptr.vmem [resolvable:$true] %s2520_s8 }
  0x2a   :  { %v120_v10 = vand.u32 4294901760, %v119_v7  ;;  %v126_v11 = vand.u32 4294901760, %v125_v8  ;;  %218 = vmatprep.subr.mxu0 %v119_v7  ;;  %v1069_v29 = vsub.f32 %v47_v21, %v2713_v25  ;;  %v1535_v39 = vsub.f32 %v50_v31, %v2721_v35  ;;  %s2633_s9 = scalar_lea.vmem %s2521_s8, 16  ;;  %s2637_s10 = scalar_lea.vmem %s2521_s8, 32 }
  0x2b   :  { %v592_v18 = vand.u32 4294901760, %v591_v12  ;;  %v598_v20 = vand.u32 4294901760, %v597_v15  ;;  %v1064_v30 = vand.u32 4294901760, %v1063_v27  ;;  %v1541_v41 = vsub.f32 %v49_v33, %v2725_v37  ;;  %p2634_p2 = scmp.ne.s32.totalorder %s2521_s8, %s2633_s9  ;;  %p2638_p3 = scmp.lt.s32.totalorder %s2521_s8, %s2521_s8 }
  0x2c   :  { %v121_v13 = vsub.f32 %v119_v7, %v120_v10  ;;  %v127_v14 = vsub.f32 %v125_v8, %v126_v11  ;;  %v1070_v32 = vand.u32 4294901760, %v1069_v29  ;;  %v1536_v42 = vand.u32 4294901760, %v1535_v39  ;;  %p2639_p4 = scmp.lt.s32.totalorder %s2637_s10, %s2633_s9 }
  0x2d   :  { %v593_v22 = vsub.f32 %v591_v12, %v592_v18  ;;  %v599_v24 = vsub.f32 %v597_v15, %v598_v20  ;;  %v1065_v34 = vsub.f32 %v1063_v27, %v1064_v30  ;;  %v1542_v43 = vand.u32 4294901760, %v1541_v41 }
  0x2e   :  { %v122_v16 = vand.u32 4294901760, %v121_v13  ;;  %v128_v17 = vand.u32 4294901760, %v127_v14  ;;  %v1071_v36 = vsub.f32 %v1069_v29, %v1070_v32  ;;  %v1537_v45 = vsub.f32 %v1535_v39, %v1536_v42  ;;  %p2640_p5 = por %p2639_p4, %p2638_p3 }
  0x2f   :  { %v594_v26 = vand.u32 4294901760, %v593_v22  ;;  %v600_v28 = vand.u32 4294901760, %v599_v24  ;;  %v1066_v38 = vand.u32 4294901760, %v1065_v34  ;;  %v1543_v46 = vsub.f32 %v1541_v41, %v1542_v43 }
  0x30   :  { %139 = vmatprep.subr.mxu1 %v122_v16  ;;  %123 = vmatprep.mubr.f32.mxu0 %v122_v16  ;;  %v1072_v40 = vand.u32 4294901760, %v1071_v36  ;;  %v2741_v47 = vand.u32 4294901760, %v1943_v44  ;;  %v1538_v48 = vand.u32 4294901760, %v1537_v45  ;;  %vm2471_vm3 = vcmask 57344   ;;  %p2641_p6 = pnand %p2640_p5, %p2634_p2 }
  0x31   :  { %145 = vmatpush1.xpose.msra.mxu1 %v128_v17  ;;  %129 = vmatmul.mubr.f32.vlgmr.msra.gmra.mrb[0].mxu0 %v128_v17  ;;  %v1544_v49 = vand.u32 4294901760, %v1543_v46  ;;  %vm2512_vm4 = vcmask 0  }
  0x32   :  { %221 = vmatpush1.xpose.msra.mxu0 %v125_v8  ;;  %295 = vmatprep.subr.mxu1 %v52_v3  ;;  %v2012_v50 = vsub.f32 %v1943_v44, %v2741_v47 }
  0x33   :  { %286 = vmatprep.mubr.f32.mxu0 %v119_v7  ;;  %375 = vmatprep.subr.mxu0 %v120_v10 }
  0x34   :  { %211 = vmatmul.mubr.f32.vlgmr.msra.gmra.mrb[0].mxu1 %v54_v4  ;;  %v2013_v51 = vand.u32 4294901760, %v2012_v50 }
  0x35   :  { %297 = vmatpush1.xpose.msra.mxu1 %v54_v4  ;;  %289 = vmatmul.mubr.f32.vlgmr.msra.gmra.mrb[2].mxu0 %v125_v8 }
  0x36   :  { %363 = vmatprep.mubr.f32.mxu1 %v120_v10  ;;  %379 = vmatpush1.xpose.msra.mxu0 %v126_v11  ;;  %v2014_v52 = vsub.f32 %v2012_v50, %v2013_v51 }
  0x37   :  { %451 = vmatprep.subr.mxu1 %v52_v3  ;;  %443 = vmatprep.mubr.f32.mxu0 %v52_v3 }
  0x38   :  { %367 = vmatmul.mubr.f32.vlgmr.msra.gmra.mrb[2].mxu1 %v126_v11  ;;  %525 = vmatprep.subr.mxu0 %v2705_v6  ;;  %v2015_v54 = vand.u32 4294901760, %v2014_v52 }
  0x39   :  { %453 = vmatpush1.xpose.msra.mxu1 %v54_v4  ;;  %445 = vmatmul.mubr.f32.vlgmr.msra.gmra.mrb[4].mxu0 %v54_v4 }
  0x3a   :  { %517 = vmatprep.mubr.f32.mxu1 %v52_v3  ;;  %527 = vmatpush1.xpose.msra.mxu0 %v2707_v9 }
  0x3b   :  { %611 = vmatprep.subr.mxu1 %v594_v26  ;;  %595 = vmatprep.mubr.f32.mxu0 %v594_v26 }
  0x3c   :  { %519 = vmatmul.mubr.f32.vlgmr.msra.gmra.mrb[4].mxu1 %v54_v4  ;;  %690 = vmatprep.subr.mxu0 %v591_v12 }
  0x3d   :  { %617 = vmatpush1.xpose.msra.mxu1 %v600_v28  ;;  %601 = vmatmul.mubr.f32.vlgmr.msra.gmra.mrb[6].mxu0 %v600_v28 }
  0x3e   :  { %681 = vmatprep.mubr.f32.mxu1 %v2705_v6  ;;  %693 = vmatpush1.xpose.msra.mxu0 %v597_v15 }
  0x3f   :  { %767 = vmatprep.subr.mxu1 %v2705_v6  ;;  %758 = vmatprep.mubr.f32.mxu0 %v591_v12 }
  0x40   :  { %683 = vmatmul.mubr.f32.vlgmr.msra.gmra.mrb[6].mxu1 %v2707_v9  ;;  %847 = vmatprep.subr.mxu0 %v592_v18 }
  0x41   :  { %769 = vmatpush1.xpose.msra.mxu1 %v2707_v9  ;;  %761 = vmatmul.mubr.f32.vlgmr.msra.gmra.mrb[8].mxu0 %v597_v15 }
  0x42   :  { %835 = vmatprep.mubr.f32.mxu1 %v592_v18  ;;  %851 = vmatpush1.xpose.msra.mxu0 %v598_v20 }
  0x43   :  { %923 = vmatprep.subr.mxu1 %v2705_v6  ;;  %915 = vmatprep.mubr.f32.mxu0 %v2705_v6 }
  0x44   :  { %839 = vmatmul.mubr.f32.vlgmr.msra.gmra.mrb[8].mxu1 %v598_v20  ;;  %997 = vmatprep.subr.mxu0 %v2711_v23 }
  0x45   :  { %925 = vmatpush1.xpose.msra.mxu1 %v2707_v9  ;;  %917 = vmatmul.mubr.f32.vlgmr.msra.gmra.mrb[10].mxu0 %v2707_v9 }
  0x46   :  { %989 = vmatprep.mubr.f32.mxu1 %v2705_v6  ;;  %999 = vmatpush1.xpose.msra.mxu0 %v2713_v25 }
  0x47   :  { %1083 = vmatprep.subr.mxu1 %v1066_v38  ;;  %1067 = vmatprep.mubr.f32.mxu0 %v1066_v38 }
  0x48   :  { %991 = vmatmul.mubr.f32.vlgmr.msra.gmra.mrb[10].mxu1 %v2707_v9  ;;  %1162 = vmatprep.subr.mxu0 %v1063_v27 }
  0x49   :  { %1089 = vmatpush1.xpose.msra.mxu1 %v1072_v40  ;;  %1073 = vmatmul.mubr.f32.vlgmr.msra.gmra.mrb[12].mxu0 %v1072_v40 }
  0x4a   :  { %1153 = vmatprep.mubr.f32.mxu1 %v2711_v23  ;;  %1165 = vmatpush1.xpose.msra.mxu0 %v1069_v29 }
  0x4b   :  { %1239 = vmatprep.subr.mxu1 %v2711_v23  ;;  %1230 = vmatprep.mubr.f32.mxu0 %v1063_v27 }
  0x4c   :  { %1155 = vmatmul.mubr.f32.vlgmr.msra.gmra.mrb[12].mxu1 %v2713_v25  ;;  %1319 = vmatprep.subr.mxu0 %v1064_v30 }
  0x4d   :  { %1241 = vmatpush1.xpose.msra.mxu1 %v2713_v25  ;;  %1233 = vmatmul.mubr.f32.vlgmr.msra.gmra.mrb[14].mxu0 %v1069_v29 }
  0x4e   :  { %1307 = vmatprep.mubr.f32.mxu1 %v1064_v30  ;;  %1323 = vmatpush1.xpose.msra.mxu0 %v1070_v32 }
  0x4f   :  { %1395 = vmatprep.subr.mxu1 %v2711_v23  ;;  %1387 = vmatprep.mubr.f32.mxu0 %v2711_v23 }
  0x50   :  { %1311 = vmatmul.mubr.f32.vlgmr.msra.gmra.mrb[14].mxu1 %v1070_v32  ;;  %1469 = vmatprep.subr.mxu0 %v2721_v35 }
  0x51   :  { %1397 = vmatpush1.xpose.msra.mxu1 %v2713_v25  ;;  %1389 = vmatmul.mubr.f32.vlgmr.msra.gmra.mrb[16].mxu0 %v2713_v25 }
  0x52   :  { %1461 = vmatprep.mubr.f32.mxu1 %v2711_v23  ;;  %1471 = vmatpush1.xpose.msra.mxu0 %v2725_v37 }
  0x53   :  { %1555 = vmatprep.subr.mxu1 %v1538_v48  ;;  %1539 = vmatprep.mubr.f32.mxu0 %v1538_v48 }
  0x54   :  { %1463 = vmatmul.mubr.f32.vlgmr.msra.gmra.mrb[16].mxu1 %v2713_v25  ;;  %1634 = vmatprep.subr.mxu0 %v1535_v39 }
  0x55   :  { %1561 = vmatpush1.xpose.msra.mxu1 %v1544_v49  ;;  %1545 = vmatmul.mubr.f32.vlgmr.msra.gmra.mrb[18].mxu0 %v1544_v49 }
  0x56   :  { %1625 = vmatprep.mubr.f32.mxu1 %v2721_v35  ;;  %1637 = vmatpush1.xpose.msra.mxu0 %v1541_v41 }
  0x57   :  { %1711 = vmatprep.subr.mxu1 %v2721_v35  ;;  %1702 = vmatprep.mubr.f32.mxu0 %v1535_v39 }
  0x58   :  { %1627 = vmatmul.mubr.f32.vlgmr.msra.gmra.mrb[18].mxu1 %v2725_v37  ;;  %1791 = vmatprep.subr.mxu0 %v1536_v42 }
  0x59   :  { %1713 = vmatpush1.xpose.msra.mxu1 %v2725_v37  ;;  %1705 = vmatmul.mubr.f32.vlgmr.msra.gmra.mrb[20].mxu0 %v1541_v41 }
  0x5a   :  { %1779 = vmatprep.mubr.f32.mxu1 %v1536_v42  ;;  %1795 = vmatpush1.xpose.msra.mxu0 %v1542_v43 }
  0x5b   :  { %1867 = vmatprep.subr.mxu1 %v2721_v35  ;;  %1859 = vmatprep.mubr.f32.mxu0 %v2721_v35 }
  0x5c   :  { %1783 = vmatmul.mubr.f32.vlgmr.msra.gmra.mrb[20].mxu1 %v1542_v43  ;;  %2542 = vmatprep.subr.mxu0 %v2663_v53 }
  0x5d   :  { %1869 = vmatpush1.xpose.msra.mxu1 %v2725_v37  ;;  %1861 = vmatmul.mubr.f32.vlgmr.msra.gmra.mrb[22].mxu0 %v2725_v37 }
  0x5e   :  { %1933 = vmatprep.mubr.f32.mxu1 %v2721_v35  ;;  %2543 = vmatpush3.xpose.msra.mxu0 %v2741_v47 }
  0x5f   :  { %2547 = vmatprep.subr.mxu1 %v2663_v53  ;;  %2544 = vmatprep.mubr.msk.f32.mxu0 %vm2664_vm0, %v2663_v53 }
  0x60   :  { %1935 = vmatmul.mubr.f32.vlgmr.msra.gmra.mrb[22].mxu1 %v2725_v37  ;;  %2552 = vmatprep.subr.mxu0 %v2663_v53 }
  0x61   :  { %2548 = vmatpush3.xpose.msra.mxu1 %v2015_v54  ;;  %2545 = vmatmul.mubr.f32.vlgmr.msra.gmra.mrb[24].mxu0 %v2015_v54 }
  0x62   :  { %2549 = vmatprep.mubr.msk.f32.mxu1 %vm2664_vm0, %v2663_v53  ;;  %2553 = vmatpush3.xpose.msra.mxu0 %v2012_v50 }
  0x63   :  { %2557 = vmatprep.subr.mxu1 %v2663_v53  ;;  %2554 = vmatprep.mubr.msk.f32.mxu0 %vm2664_vm0, %v2663_v53 }
  0x64   :  { %2550 = vmatmul.mubr.f32.vlgmr.msra.gmra.mrb[24].mxu1 %v2741_v47  ;;  %2562 = vmatprep.subr.mxu0 %v2663_v53 }
  0x65   :  { %2558 = vmatpush3.xpose.msra.mxu1 %v2741_v47  ;;  %2555 = vmatmul.mubr.f32.vlgmr.msra.gmra.mrb[26].mxu0 %v2012_v50 }
  0x66   :  { %2559 = vmatprep.mubr.msk.f32.mxu1 %vm2664_vm0, %v2663_v53  ;;  %2563 = vmatpush3.xpose.msra.mxu0 %v2013_v51 }
  0x67   :  { %2567 = vmatprep.subr.mxu1 %v2663_v53  ;;  %2564 = vmatprep.mubr.msk.f32.mxu0 %vm2664_vm0, %v2663_v53 }
  0x68   :  { %2560 = vmatmul.mubr.f32.vlgmr.msra.gmra.mrb[26].mxu1 %v2013_v51 }
  0x69   :  { %2568 = vmatpush3.xpose.msra.mxu1 %v2741_v47  ;;  %2565 = vmatmul.mubr.f32.vlgmr.msra.gmra.mrb[28].mxu0 %v2741_v47 }
  0x6a   :  { %2569 = vmatprep.mubr.msk.f32.mxu1 %vm2664_vm0, %v2663_v53 }
  0x6c   :  { %2570 = vmatmul.mubr.f32.vlgmr.msra.gmra.mrb[28].mxu1 %v2741_v47 }
 0x104   :  { %v130_v55 = vpop.f32.mrb[0].mxu0 }
 0x105   :  { %v132_v56 = vpop.f32.mrb[1].mxu0 }
 0x107   :  { %v212_v57 = vpop.f32.mrb[0].mxu1 }
 0x108   :  { %v213_v58 = vadd.f32 %v212_v57, %v130_v55  ;;  %v214_v59 = vpop.f32.mrb[1].mxu1  ;;  %v290_v60 = vpop.f32.mrb[2].mxu0 }
 0x109   :  { %v292_v61 = vpop.f32.mrb[3].mxu0  ;;  %v51_v59 = vld [vmem:[#allocation2] sm:$0xff] }
 0x10a   :  { %v291_v62 = vadd.f32 %v290_v60, %v213_v58 }
 0x10b   :  { %v368_v63 = vpop.f32.mrb[2].mxu1 }
 0x10c   :  { %v369_v0 = vadd.f32 %v368_v63, %v291_v62  ;;  %v370_v1 = vpop.f32.mrb[3].mxu1  ;;  %v446_v2 = vpop.f32.mrb[4].mxu0 }
 0x10d   :  { %v448_v3 = vpop.f32.mrb[5].mxu0  ;;  %v2396_v1 = vlaneseq }
 0x10e   :  { %v447_v4 = vadd.f32 %v446_v2, %v369_v0 }
 0x10f   :  { %v520_v5 = vpop.f32.mrb[4].mxu1 }
 0x110   :  { %v521_v6 = vadd.f32 %v520_v5, %v447_v4  ;;  %v522_v7 = vpop.f32.mrb[5].mxu1  ;;  %v602_v8 = vpop.f32.mrb[6].mxu0 }
 0x111   :  { %v604_v9 = vpop.f32.mrb[7].mxu0 }
 0x112   :  { %v603_v10 = vadd.f32 %v602_v8, %v521_v6  ;;  %v2397_v8 = vshrl.u32 %v2396_v1, 7  ;;  %v2399_v9 = vand.u32 127, %v2396_v1 }
 0x113   :  { %v684_v11 = vpop.f32.mrb[6].mxu1 }
 0x114   :  { %v685_v12 = vadd.f32 %v684_v11, %v603_v10  ;;  %v686_v13 = vpop.f32.mrb[7].mxu1  ;;  %v762_v14 = vpop.f32.mrb[8].mxu0  ;;  %vm2400_vm2 = vcmp.eq.s32.totalorder %v2397_v8, %v2399_v9 }
 0x115   :  { %v764_v15 = vpop.f32.mrb[9].mxu0 }
 0x116   :  { %v763_v16 = vadd.f32 %v762_v14, %v685_v12 }
 0x117   :  { %v840_v17 = vpop.f32.mrb[8].mxu1 }
 0x118   :  { %v841_v18 = vadd.f32 %v840_v17, %v763_v16  ;;  %v842_v19 = vpop.f32.mrb[9].mxu1  ;;  %v918_v20 = vpop.f32.mrb[10].mxu0  ;;  %v1944_v17 = vld [vmem:[#allocation3] sm:$0xff] }
 0x119   :  { %v920_v21 = vpop.f32.mrb[11].mxu0 }
 0x11a   :  { %v919_v22 = vadd.f32 %v918_v20, %v841_v18 }
 0x11b   :  { %v992_v23 = vpop.f32.mrb[10].mxu1 }
 0x11c   :  { %v993_v24 = vadd.f32 %v992_v23, %v919_v22  ;;  %v994_v25 = vpop.f32.mrb[11].mxu1  ;;  %v1074_v26 = vpop.f32.mrb[12].mxu0 }
 0x11d   :  { %v1076_v27 = vpop.f32.mrb[13].mxu0 }
 0x11e   :  { %v1075_v28 = vadd.f32 %v1074_v26, %v993_v24 }
 0x11f   :  { %v1156_v29 = vpop.f32.mrb[12].mxu1 }
 0x120   :  { %v1157_v30 = vadd.f32 %v1156_v29, %v1075_v28  ;;  %v1158_v31 = vpop.f32.mrb[13].mxu1  ;;  %v1234_v32 = vpop.f32.mrb[14].mxu0 }
 0x121   :  { %v1236_v33 = vpop.f32.mrb[15].mxu0 }
 0x122   :  { %v1235_v34 = vadd.f32 %v1234_v32, %v1157_v30 }
 0x123   :  { %v1312_v35 = vpop.f32.mrb[14].mxu1 }
 0x124   :  { %v1313_v36 = vadd.f32 %v1312_v35, %v1235_v34  ;;  %v1314_v37 = vpop.f32.mrb[15].mxu1  ;;  %v1390_v38 = vpop.f32.mrb[16].mxu0 }
 0x125   :  { %v1392_v39 = vpop.f32.mrb[17].mxu0 }
 0x126   :  { %v1391_v40 = vadd.f32 %v1390_v38, %v1313_v36 }
 0x127   :  { %v1464_v41 = vpop.f32.mrb[16].mxu1 }
 0x128   :  { %v1465_v42 = vadd.f32 %v1464_v41, %v1391_v40  ;;  %v1466_v43 = vpop.f32.mrb[17].mxu1  ;;  %v1546_v44 = vpop.f32.mrb[18].mxu0 }
 0x129   :  { %v1548_v45 = vpop.f32.mrb[19].mxu0 }
 0x12a   :  { %v1547_v46 = vadd.f32 %v1546_v44, %v1465_v42 }
 0x12b   :  { %v1628_v47 = vpop.f32.mrb[18].mxu1 }
 0x12c   :  { %v1629_v48 = vadd.f32 %v1628_v47, %v1547_v46  ;;  %v1630_v49 = vpop.f32.mrb[19].mxu1  ;;  %v1706_v50 = vpop.f32.mrb[20].mxu0 }
 0x12d   :  { %v1708_v51 = vpop.f32.mrb[21].mxu0 }
 0x12e   :  { %v1707_v52 = vadd.f32 %v1706_v50, %v1629_v48 }
 0x12f   :  { %v1784_v53 = vpop.f32.mrb[20].mxu1 }
 0x130   :  { %v1785_v54 = vadd.f32 %v1784_v53, %v1707_v52  ;;  %v1786_v55 = vpop.f32.mrb[21].mxu1  ;;  %v1862_v56 = vpop.f32.mrb[22].mxu0 }
 0x131   :  { %v1864_v57 = vpop.f32.mrb[23].mxu0 }
 0x132   :  { %v1863_v58 = vadd.f32 %v1862_v56, %v1785_v54 }
 0x133   :  { %v1936_v60 = vpop.f32.mrb[22].mxu1 }
 0x134   :  { %v1937_v61 = vadd.f32 %v1936_v60, %v1863_v58  ;;  %v1938_v62 = vpop.f32.mrb[23].mxu1  ;;  %v2017_v63 = vpop.f32.mrb[24].mxu0 }
 0x135   :  { %v2546_v0 = vpop.f32.mrb[25].mxu0 }
 0x136   :  { %v1940_v2 = vadd.f32 %v1937_v61, %v51_v59 }
 0x137   :  { %v2093_v3 = vpop.f32.mrb[24].mxu1 }
 0x138   :  { %1942 = vst.msk [vmem:[#allocation2] sm:$0xff] %vm40_vm1, %v1940_v2  ;;  %v2094_v4 = vadd.f32 %v2093_v3, %v2017_v63  ;;  %v2551_v5 = vpop.f32.mrb[25].mxu1  ;;  %v2167_v6 = vpop.f32.mrb[26].mxu0 }
 0x139   :  { %v2556_v7 = vpop.f32.mrb[27].mxu0 }
 0x13a   :  { %v2168_v10 = vadd.f32 %v2167_v6, %v2094_v4 }
 0x13b   :  { %v2241_v11 = vpop.f32.mrb[26].mxu1 }
 0x13c   :  { %v2242_v12 = vadd.f32 %v2241_v11, %v2168_v10  ;;  %v2561_v13 = vpop.f32.mrb[27].mxu1  ;;  %v2315_v14 = vpop.f32.mrb[28].mxu0 }
 0x13d   :  { %v2566_v15 = vpop.f32.mrb[29].mxu0 }
 0x13e   :  { %v2316_v16 = vadd.f32 %v2315_v14, %v2242_v12 }
 0x13f   :  { %v2387_v18 = vpop.f32.mrb[28].mxu1  ;;  %v2401_v19 = vld [vmem:[#allocation2] sm:$0xff] }
 0x140   :  { %v2388_v20 = vadd.f32 %v2387_v18, %v2316_v16  ;;  %v2571_v21 = vpop.f32.mrb[29].mxu1  ;;  %v2402_v22 = vsel %vm2400_vm2, %v2401_v19, 0.0  ;;  %v2413_v38 = vmul.f32 2.0, %v2401_v19 }
 0x141   :  { %v2403_v23 = vsel %vm40_vm1, %v2402_v22, 0.0 }
 0x142   :  { %v2391_v24 = vadd.f32 %v2388_v20, %v1944_v17  ;;  %2404 = vadd.xlane.f32.xlu0 %v2403_v23  ;;  %v2406_v28 = vrot.slane %v2403_v23, 4 }
 0x144   :  { %2392 = vst.msk [vmem:[#allocation3] sm:$0xff] %vm40_vm1, %v2391_v24  ;;  %v2407_v29 = vadd.f32 %v2406_v28, %v2403_v23 }
 0x146   :  { %v2408_v30 = vrot.slane %v2407_v29, 2 }
 0x148   :  { %v2409_v32 = vadd.f32 %v2408_v30, %v2407_v29 }
 0x14a   :  { %v2410_v34 = vrot.slane %v2409_v32, 1 }
 0x14b   :  { %v2420_v25 = vld [vmem:[#allocation3] sm:$0xff] }
 0x14c   :  { %v2421_v26 = vsel %vm2400_vm2, %v2420_v25, 0.0  ;;  %v2411_v36 = vadd.f32 %v2410_v34, %v2409_v32  ;;  %v2432_v48 = vmul.f32 2.0, %v2420_v25 }
 0x14d   :  { %v2422_v27 = vsel %vm40_vm1, %v2421_v26, 0.0 }
 0x14e   :  { %2423 = vadd.xlane.f32.xlu0 %v2422_v27  ;;  %v2425_v31 = vrot.slane %v2422_v27, 4 }
 0x150   :  { %v2426_v33 = vadd.f32 %v2425_v31, %v2422_v27 }
 0x152   :  { %v2427_v35 = vrot.slane %v2426_v33, 2 }
 0x154   :  { %v2428_v41 = vadd.f32 %v2427_v35, %v2426_v33 }
 0x156   :  { %v2429_v44 = vrot.slane %v2428_v41, 1 }
 0x158   :  { %v2430_v46 = vadd.f32 %v2429_v44, %v2428_v41 }
 0x1cf   :  { %v2405_v37 = vpop.xlane.xlu0 %2404 }
 0x1d0   :  { %v2412_v39 = vadd.f32 %v2411_v36, %v2405_v37 }
 0x1d2   :  { %v2414_v40 = vsub.f32 %v2412_v39, %v2413_v38 }
 0x1d4   :  { %v2415_v42 = vmax.f32 %v2414_v40, 0.0 }
 0x1d6   :  { %v2416_v43 = vmul.f32 -0.001953125, %v2415_v42 }
 0x1d8   :  { %v2417_v45 = vmul.f32 1.442695, %v2416_v43 }
 0x1da   :  { %2585 = vpow2.f32 %v2417_v45 }
 0x1db   :  { %v2424_v47 = vpop.xlane.xlu0 %2423 }
 0x1dc   :  { %v2431_v49 = vadd.f32 %v2430_v46, %v2424_v47 }
 0x1de   :  { %v2433_v50 = vsub.f32 %v2431_v49, %v2432_v48 }
 0x1e0   :  { %v2434_v51 = vmax.f32 %v2433_v50, 0.0 }
 0x1e2   :  { %v2435_v52 = vmul.f32 -0.03125, %v2434_v51 }
 0x1e4   :  { %v2586_v53 = vpop.eup %2585  ;;  %v2436_v54 = vmul.f32 1.442695, %v2435_v52 }
 0x1e5   :  { %2419 = vst.msk [vmem:[#allocation2] sm:$0xff] %vm40_vm1, %v2586_v53  ;;  %v2448_v55 = vsel %vm40_vm1, %v2586_v53, 0.0 }
 0x1e6   :  { %2587 = vpow2.f32 %v2436_v54  ;;  %v2449_v56 = vrot.slane %v2448_v55, 4 }
 0x1e8   :  { %v2450_v57 = vadd.f32 %v2449_v56, %v2448_v55 }
 0x1ea   :  { %v2451_v58 = vrot.slane %v2450_v57, 2 }
 0x1ec   :  { %v2452_v63 = vadd.f32 %v2451_v58, %v2450_v57 }
 0x1ee   :  { %v2453_v3 = vrot.slane %v2452_v63, 1 }
 0x1f0   :  { %v2588_v59 = vpop.eup %2587  ;;  %v2454_v6 = vadd.f32 %v2453_v3, %v2452_v63 }
 0x1f1   :  { %2438 = vst.msk [vmem:[#allocation3] sm:$0xff] %vm40_vm1, %v2588_v59  ;;  %v2456_v60 = vmul.f32 %v2588_v59, %v2586_v53  ;;  %v2439_v61 = vsel %vm40_vm1, %v2588_v59, 0.0 }
 0x1f2   :  { %v2440_v62 = vrot.slane %v2439_v61, 4  ;;  %v2455_v9 = vmul.f32 0.125, %v2454_v6 }
 0x1f3   :  { %v2457_v0 = vsel %vm40_vm1, %v2456_v60, 0.0 }
 0x1f4   :  { %2458 = vadd.xlane.f32.xlu1 %v2457_v0  ;;  %v2441_v1 = vadd.f32 %v2440_v62, %v2439_v61  ;;  %v2498_v13 = vsel %vm2471_vm3, %v2455_v9, 0.0 }
 0x1f6   :  { %v2442_v2 = vrot.slane %v2441_v1, 2 }
 0x1f8   :  { %v2443_v4 = vadd.f32 %v2442_v2, %v2441_v1 }
 0x1fa   :  { %v2444_v5 = vrot.slane %v2443_v4, 1 }
 0x1fc   :  { %v2445_v7 = vadd.f32 %v2444_v5, %v2443_v4 }
 0x1fe   :  { %v2447_v8 = vmul.f32 0.125, %v2445_v7 }
 0x200   :  { %v2486_v10 = vsel %vm2471_vm3, %v2447_v8, 0.0  ;;  %v2470_v11 = vmul.f32 %v2455_v9, %v2447_v8 }
 0x201   :  { %2487 = vadd.xlane.f32.xlu0 %v2486_v10 }
 0x202   :  { %v2472_v12 = vsel %vm2471_vm3, %v2470_v11, 0.0 }
 0x203   :  { %2473 = vadd.xlane.f32.xlu1 %v2472_v12 }
 0x207   :  { %2499 = vadd.xlane.f32.xlu1 %v2498_v13 }
 0x281   :  { %v2459_v14 = vpop.xlane.xlu1 %2458 }
 0x282   :  { %v2460_v15 = vrot.slane %v2459_v14, 4 }
 0x284   :  { %v2461_v16 = vadd.f32 %v2460_v15, %v2459_v14 }
 0x286   :  { %v2462_v17 = vrot.slane %v2461_v16, 2 }
 0x288   :  { %v2463_v18 = vadd.f32 %v2462_v17, %v2461_v16 }
 0x28a   :  { %v2464_v19 = vrot.slane %v2463_v18, 1 }
 0x28c   :  { %v2465_v20 = vadd.f32 %v2464_v19, %v2463_v18 }
 0x28e   :  { %v2488_v21 = vpop.xlane.xlu0 %2487  ;;  %2572 = vpush %v2465_v20 }
 0x28f   :  { %v2489_v22 = vrot.slane %v2488_v21, 4 }
 0x290   :  { %v2474_v23 = vpop.xlane.xlu1 %2473 }
 0x291   :  { %v2490_v24 = vadd.f32 %v2489_v22, %v2488_v21  ;;  %v2475_v25 = vrot.slane %v2474_v23, 4 }
 0x293   :  { %v2491_v26 = vrot.slane %v2490_v24, 2  ;;  %v2476_v27 = vadd.f32 %v2475_v25, %v2474_v23 }
 0x294   :  { %v2500_v28 = vpop.xlane.xlu1 %2499 }
 0x295   :  { %v2492_v29 = vadd.f32 %v2491_v26, %v2490_v24  ;;  %v2477_v30 = vrot.slane %v2476_v27, 2  ;;  %v2501_v31 = vrot.slane %v2500_v28, 4 }
 0x297   :  { %v2502_v32 = vadd.f32 %v2501_v31, %v2500_v28  ;;  %v2478_v33 = vadd.f32 %v2477_v30, %v2476_v27  ;;  %v2493_v34 = vrot.slane %v2492_v29, 1 }
 0x299   :  { %v2503_v35 = vrot.slane %v2502_v32, 2  ;;  %v2479_v36 = vrot.slane %v2478_v33, 1  ;;  %v2494_v39 = vadd.f32 %v2493_v34, %v2492_v29 }
 0x29b   :  { %v2504_v37 = vadd.f32 %v2503_v35, %v2502_v32  ;;  %v2480_v38 = vadd.f32 %v2479_v36, %v2478_v33 }
 0x29d   :  { %2574 = vpush %v2480_v38  ;;  %v2505_v40 = vrot.slane %v2504_v37, 1 }
 0x29e   :  { %2576 = vpush %v2494_v39 }
 0x29f   :  { %v2506_v41 = vadd.f32 %v2505_v40, %v2504_v37 }
 0x2a1   :  { %2578 = vpush %v2506_v41 }
 0x2bf   :  { %s2573_s1 = spop %2572 }
 0x2c0   :  { %v2467_v44 = vstv %s2573_s1 }
 0x2c1   :  { %v2469_v48 = vmul.f32 0.015625, %v2467_v44 }
 0x2ce   :  { %s2575_s4 = spop %2574 }
 0x2cf   :  { %v2482_v42 = vstv %s2575_s4  ;;  %s2577_s5 = spop %2576 }
 0x2d0   :  { %v2483_v43 = vmul.f32 0.125, %v2482_v42  ;;  %v2496_v45 = vstv %s2577_s5 }
 0x2d1   :  { %v2497_v49 = vmul.f32 0.125, %v2496_v45 }
 0x2d2   :  { %v2484_v46 = vmul.f32 2.0, %v2483_v43  ;;  %s2579_s6 = spop %2578 }
 0x2d3   :  { %v2508_v47 = vstv %s2579_s6 }
 0x2d4   :  { %v2509_v50 = vmul.f32 0.125, %v2508_v47  ;;  %v2485_v51 = vsub.f32 %v2469_v48, %v2484_v46 }
 0x2d6   :  { %v2510_v52 = vmul.f32 %v2509_v50, %v2497_v49 }
 0x2d8   :  { %v2511_v53 = vadd.f32 %v2510_v52, %v2485_v51 }
 0x2da   :  { %2513 = vst.msk [vmem:[#allocation9] sm:$0x1] %vm2512_vm4, %v2511_v53 }
 0x2db   :  { %2644 = shalt.err (!%p2641_p6)
}
 0x2dc   :  { %s2645_s13 = scalar_lea.hbm %s2799_s2, 16 }
 0x2dd   :  { %p2646_p7 = scmp.ne.s32.totalorder %s2799_s2, %s2645_s13  ;;  %p2649_p8 = scmp.lt.u32.totalorder %s2645_s13, %s2799_s2 }
 0x2df   :  { %p2651_p9 = pnand %p2649_p8, %p2646_p7 }
 0x2e1   :  { %2654 = shalt.err (!%p2651_p9)
}
 0x2e2   :  { %2523 = dma.vmem_to_hbm [thread:$0]  %s2521_s8, 16, %s2799_s2, [#allocation6]  }
 0x2e3   :  { %2659 = dma.done.wait [#allocation6], 16  }
 0x2e4   :  { %2660 = vsyncadd [#allocation6], 4294967280 }
 0x2e5   :  { %2527 = vsyncpa [#allocation5], 1 }
 0x2e6   :  { %2528 = vsyncpa [#allocation8], 1 }
 0x2e7   :  { %2529 = vsyncpa [#allocation6], 1 }

</bundles_post_ra>
